<compile_context>
chip_gen: v7x
topology: tpu7x:2x2x1
jax: 0.10.0
libtpu: 0.0.40
codegen_flags: <defaults>
</compile_context>

<pallas_src>
import functools

import jax
import jax.numpy as jnp
from jax.experimental import pallas as pl
from jax.experimental.pallas import tpu as pltpu

IGNORE_INDEX = -100
_NEG_BIG = -1e30  # finite "-inf": keeps exp() exactly 0 without inf*0 NaNs.


def _fkl_kernel(s_ref, t_ref, x_ref,
                tmax_sc, smax_sc, tsum_sc, ssum_sc, cross_sc,
                *, v_total, tv, mask_cols):
    """Online-softmax forward-KL cross term over (row tiles, vocab tiles).

    Carries (per row, kept in VMEM scratch across the vocab axis):
      tmax  = running max of teacher logits
      tsum  = sum exp(t - tmax)
      smax  = running max of student logits
      ssum  = sum exp(s - smax)
      cross = sum exp(t - tmax) * (s - smax)
    Final: x = cross / tsum - log(ssum)
             = sum softmax(t) * log_softmax(s)
    """
    j = pl.program_id(1)

    @pl.when(j == 0)
    def _init():
        tmax_sc[...] = jnp.full(tmax_sc.shape, _NEG_BIG, dtype=jnp.float32)
        smax_sc[...] = jnp.full(smax_sc.shape, _NEG_BIG, dtype=jnp.float32)
        tsum_sc[...] = jnp.zeros(tsum_sc.shape, dtype=jnp.float32)
        ssum_sc[...] = jnp.zeros(ssum_sc.shape, dtype=jnp.float32)
        cross_sc[...] = jnp.zeros(cross_sc.shape, dtype=jnp.float32)

    s = s_ref[...].astype(jnp.float32)   # (tm, tv)
    t = t_ref[...].astype(jnp.float32)   # (tm, tv)

    if mask_cols:  # static: only traced when V % tv != 0 (partial last block)
        col = jax.lax.broadcasted_iota(jnp.int32, s.shape, 1)
        valid = col < (v_total - j * tv)
        s = jnp.where(valid, s, _NEG_BIG)
        t = jnp.where(valid, t, _NEG_BIG)

    t_max_old = tmax_sc[...]                                         # (tm, 1)
    s_max_old = smax_sc[...]
    t_max = jnp.maximum(t_max_old, jnp.max(t, axis=-1, keepdims=True))
    s_max = jnp.maximum(s_max_old, jnp.max(s, axis=-1, keepdims=True))
    alpha = jnp.exp(t_max_old - t_max)        # rescale for teacher carries
    beta = jnp.exp(s_max_old - s_max)         # rescale for student sum

    t_exp = jnp.exp(t - t_max)                                       # (tm, tv)
    s_shift = s - s_max                                              # (tm, tv)

    t_sum_scaled = alpha * tsum_sc[...]
    tsum_sc[...] = t_sum_scaled + jnp.sum(t_exp, axis=-1, keepdims=True)
    ssum_sc[...] = beta * ssum_sc[...] + jnp.sum(jnp.exp(s_shift), axis=-1,
                                                 keepdims=True)
    # Old cross was accumulated relative to (t_max_old, s_max_old); correct it
    # for both new maxes, then add this block's contribution.
    cross_sc[...] = (alpha * cross_sc[...]
                     - (s_max - s_max_old) * t_sum_scaled
                     + jnp.sum(t_exp * s_shift, axis=-1, keepdims=True))
    tmax_sc[...] = t_max
    smax_sc[...] = s_max

    @pl.when(j == pl.num_programs(1) - 1)
    def _finalize():
        # Exact reciprocal: (tm,1) wide; approx=True would risk tolerance.
        x_ref[...] = (cross_sc[...] * pl.reciprocal(tsum_sc[...])
                      - jnp.log(ssum_sc[...]))


def _vmem_capacity_bytes() -> int:
    try:
        info = pltpu.get_tpu_info()
        cap = getattr(info, "vmem_capacity_bytes", None)
        if cap:
            return int(cap)
    except Exception:
        pass
    return 64 * 1024 * 1024  # conservative (v7x per-TensorCore)


def _choose_tiles(n_rows: int, vocab: int, isz_s: int, isz_t: int,
                  budget_bytes: int, gran: int) -> tuple[int, int]:
    """Pick (tm, tv).  tv == vocab => single-pass row kernel."""
    # Per block element: double-buffered streamed inputs (2 inputs x 2 bufs)
    # plus ~6 live f32 (tm, tv) temporaries in the body
    # (s, t, t_exp, s_shift, exp(s_shift), t_exp*s_shift).
    bytes_per_elem = 2 * (isz_s + isz_t) + 6 * 4
    # Per tile row: 5 lane-padded (tm,128) f32 carries + double-buffered
    # lane-padded (tm,128) f32 output block.
    fixed_per_row = (5 + 2) * 128 * 4

    # Keep >= ~8 row grid steps when N allows (megacore + pipelining), capped
    # at 1024 rows per tile.
    row_cap = max(gran, ((n_rows // 8) // gran) * gran)
    row_cap = min(row_cap, 1024)

    # Path 1: single vocab block (full V per row tile).
    tm_full = budget_bytes // (vocab * bytes_per_elem + fixed_per_row)
    tm_full = min((tm_full // gran) * gran, row_cap)
    if tm_full >= min(row_cap, 128):
        return int(tm_full), int(vocab)

    # Path 2: vocab split - keep the row tile large, tile the vocab axis.
    tm = min(256, row_cap)
    tm = max(gran, (tm // gran) * gran)
    avail = max(budget_bytes - tm * fixed_per_row, tm * bytes_per_elem * 128)
    tv = (avail // (tm * bytes_per_elem) // 128) * 128
    tv = max(128, tv)
    if tv >= vocab or vocab <= 128:
        tv = vocab
    return int(tm), int(tv)


def forward_kl_loss(student_logits, teacher_logits, labels, *,
                    ignore_index: int = IGNORE_INDEX,
                    tm: int | None = None, tv: int | None = None):
    """student_logits/teacher_logits: (..., V) float; labels: (...) int.

    bf16 logits are the recommended streaming dtype on v5e/v6e (HBM-bound);
    all softmax/LSE math is done in f32 inside the kernel regardless.
    """
    V = student_logits.shape[-1]
    s = student_logits.reshape(-1, V)
    t = teacher_logits.reshape(-1, V)
    N = s.shape[0]

    isz_s = jnp.dtype(s.dtype).itemsize
    isz_t = jnp.dtype(t.dtype).itemsize
    # Sub-32-bit inputs pack along sublanes -> bump the row granularity.
    gran = max(8, 32 // min(isz_s, isz_t))

    # ~96 MiB scoped limit on 128 MiB parts (v5e/v6e), ~48 MiB on 64 MiB v7x;
    # tiles sized to ~80% of that limit.
    vmem_limit = min(int(_vmem_capacity_bytes() * 0.75), 100 * 1024 * 1024)
    budget = int(vmem_limit * 0.8)

    auto_tm, auto_tv = _choose_tiles(N, V, isz_s, isz_t, budget, gran)
    if tm is None:
        tm = auto_tm
    else:
        tm = max(gran, (int(tm) // gran) * gran)
    if tv is None:
        tv = auto_tv
    else:
        tv = int(tv)
        tv = V if tv >= V else max(128, (tv // 128) * 128)
    tv = min(tv, V)

    mask_cols = (V % tv) != 0
    grid = (pl.cdiv(N, tm), pl.cdiv(V, tv))

    kernel = functools.partial(_fkl_kernel, v_total=V, tv=tv,
                               mask_cols=mask_cols)

    x = pl.pallas_call(
        kernel,
        out_shape=jax.ShapeDtypeStruct((N, 1), jnp.float32),
        grid_spec=pltpu.PrefetchScalarGridSpec(
            num_scalar_prefetch=0,
            grid=grid,
            in_specs=[
                pl.BlockSpec((tm, tv), lambda i, j: (i, j)),
                pl.BlockSpec((tm, tv), lambda i, j: (i, j)),
            ],
            # Output block is revisited across the vocab axis and only stored
            # on the last vocab step (accumulator pattern).
            out_specs=pl.BlockSpec((tm, 1), lambda i, j: (i, 0)),
            scratch_shapes=[pltpu.VMEM((tm, 1), jnp.float32)
                            for _ in range(5)],
        ),
        compiler_params=pltpu.CompilerParams(
            dimension_semantics=("parallel", "arbitrary"),
            vmem_limit_bytes=int(vmem_limit),
        ),
    )(s, t)

    x = x[:, 0]                                                       # (N,)
    mask = (labels.reshape(-1) != ignore_index).astype(jnp.float32)
    # NOTE: if every label is ignored this yields 0/0 = NaN, matching the
    # PyTorch module's behavior.
    return (-jnp.sum(x * mask) / jnp.sum(mask)).astype(jnp.float32)


def _reference(student_logits, teacher_logits, labels,
               ignore_index=IGNORE_INDEX):
    t_prob = jax.nn.softmax(teacher_logits.astype(jnp.float32), axis=-1)
    s_logprob = jax.nn.log_softmax(student_logits.astype(jnp.float32), axis=-1)
    x = jnp.sum(t_prob * s_logprob, axis=-1).reshape(-1)
    mask = (labels.reshape(-1) != ignore_index).astype(jnp.float32)
    return -jnp.sum(x * mask) / jnp.sum(mask)


if __name__ == "__main__":
    key = jax.random.PRNGKey(0)
    k1, k2, k3, k4, k5 = jax.random.split(key, 5)

    B, S, V = 2, 8, 128
    student = jax.random.normal(k1, (B, S, V), dtype=jnp.float32)
    teacher = jax.random.normal(k2, (B, S, V), dtype=jnp.float32)
    labels = jax.random.randint(k3, (B, S), 0, V).astype(jnp.int32)
    labels = labels.at[0, :3].set(IGNORE_INDEX)
    labels = labels.at[1, 5].set(IGNORE_INDEX)

    # 1) f32 path, auto tile sizes (single vocab block, multiple row steps).
    loss = jax.block_until_ready(forward_kl_loss(student, teacher, labels))
    ref = _reference(student, teacher, labels)
    assert jnp.allclose(loss, ref, atol=1e-4, rtol=1e-4), (loss, ref)

    # 2) Explicit small row tile exercises the multi-row-step path.
    loss_tiled = jax.block_until_ready(
        forward_kl_loss(student, teacher, labels, tm=8))
    assert jnp.allclose(loss_tiled, ref, atol=1e-4, rtol=1e-4), (loss_tiled, ref)

    # 3) Non-divisible row count exercises the padding-free partial row block
    #    (masked boundary reads/writes; no wrapper-side jnp.pad).
    loss_odd = jax.block_until_ready(
        forward_kl_loss(student[:, :7], teacher[:, :7], labels[:, :7]))
    ref_odd = _reference(student[:, :7], teacher[:, :7], labels[:, :7])
    assert jnp.allclose(loss_odd, ref_odd, atol=1e-4, rtol=1e-4), (loss_odd, ref_odd)

    # 4) bf16-streamed inputs (recommended on v5e/v6e: halves HBM traffic);
    #    reference uses the same bf16 values upcast to f32, matching the
    #    kernel's in-kernel f32 math.
    s16 = student.astype(jnp.bfloat16)
    t16 = teacher.astype(jnp.bfloat16)
    loss16 = jax.block_until_ready(forward_kl_loss(s16, t16, labels))
    ref16 = _reference(s16, t16, labels)
    assert jnp.allclose(loss16, ref16, atol=1e-4, rtol=1e-4), (loss16, ref16)

    # 5) Vocab-split path with online-softmax carries + partial last vocab
    #    block masking (V=320, tv=128 -> 3 vocab steps, last one masked).
    V2 = 320
    student2 = jax.random.normal(k4, (B, S, V2), dtype=jnp.float32)
    teacher2 = jax.random.normal(k5, (B, S, V2), dtype=jnp.float32)
    labels2 = jax.random.randint(k3, (B, S), 0, V2).astype(jnp.int32)
    labels2 = labels2.at[1, 0].set(IGNORE_INDEX)
    loss_vt = jax.block_until_ready(
        forward_kl_loss(student2, teacher2, labels2, tm=8, tv=128))
    ref_vt = _reference(student2, teacher2, labels2)
    assert jnp.allclose(loss_vt, ref_vt, atol=1e-4, rtol=1e-4), (loss_vt, ref_vt)

    print("KERNEL_OK")
</pallas_src>

<mosaic_0001>
module attributes {stable_mosaic.version = 11 : i64} {
  func.func @_fkl_kernel(%arg0: i32, %arg1: i32, %arg2: memref<8x128xf32, #tpu.memory_space<vmem>>, %arg3: memref<8x128xf32, #tpu.memory_space<vmem>>, %arg4: memref<8x1xf32, #tpu.memory_space<vmem>>, %arg5: memref<8x1xf32, #tpu.memory_space<vmem>>, %arg6: memref<8x1xf32, #tpu.memory_space<vmem>>, %arg7: memref<8x1xf32, #tpu.memory_space<vmem>>, %arg8: memref<8x1xf32, #tpu.memory_space<vmem>>, %arg9: memref<8x1xf32, #tpu.memory_space<vmem>>) attributes {dimension_semantics = [#tpu.dimension_semantics<parallel>, #tpu.dimension_semantics<arbitrary>], iteration_bounds = array<i64: 2, 1>, scalar_prefetch = 0 : i64, scratch_operands = 5 : i64, tpu.core_type = #tpu.core_type<tc>, window_params = [{transform_indices = @transform_0, window_bounds = array<i64: 8, 128>}, {transform_indices = @transform_1, window_bounds = array<i64: 8, 128>}, {transform_indices = @transform_2, window_bounds = array<i64: 8, 1>}]} {
    %c0_i32 = arith.constant 0 : i32
    %0 = arith.cmpi eq, %arg1, %c0_i32 : i32
    %1 = arith.extui %0 : i1 to i32
    %c0_i32_0 = arith.constant 0 : i32
    %2 = arith.cmpi ne, %1, %c0_i32_0 : i32
    scf.if %2 {
      %cst_30 = arith.constant -1.000000e+30 : f32
      %50 = vector.broadcast %cst_30 : f32 to vector<8x1xf32>
      %c0_31 = arith.constant 0 : index
      %c0_32 = arith.constant 0 : index
      %51 = vector.load %arg5[%c0_31, %c0_32] : memref<8x1xf32, #tpu.memory_space<vmem>>, vector<8x1xf32>
      tpu.vector_store %arg5[%c0_31, %c0_32], %50 {strides = array<i32>} : memref<8x1xf32, #tpu.memory_space<vmem>>, vector<8x1xf32>,
      %cst_33 = arith.constant -1.000000e+30 : f32
      %52 = vector.broadcast %cst_33 : f32 to vector<8x1xf32>
      %c0_34 = arith.constant 0 : index
      %c0_35 = arith.constant 0 : index
      %53 = vector.load %arg6[%c0_34, %c0_35] : memref<8x1xf32, #tpu.memory_space<vmem>>, vector<8x1xf32>
      tpu.vector_store %arg6[%c0_34, %c0_35], %52 {strides = array<i32>} : memref<8x1xf32, #tpu.memory_space<vmem>>, vector<8x1xf32>,
      %cst_36 = arith.constant 0.000000e+00 : f32
      %54 = vector.broadcast %cst_36 : f32 to vector<8x1xf32>
      %c0_37 = arith.constant 0 : index
      %c0_38 = arith.constant 0 : index
      %55 = vector.load %arg7[%c0_37, %c0_38] : memref<8x1xf32, #tpu.memory_space<vmem>>, vector<8x1xf32>
      tpu.vector_store %arg7[%c0_37, %c0_38], %54 {strides = array<i32>} : memref<8x1xf32, #tpu.memory_space<vmem>>, vector<8x1xf32>,
      %cst_39 = arith.constant 0.000000e+00 : f32
      %56 = vector.broadcast %cst_39 : f32 to vector<8x1xf32>
      %c0_40 = arith.constant 0 : index
      %c0_41 = arith.constant 0 : index
      %57 = vector.load %arg8[%c0_40, %c0_41] : memref<8x1xf32, #tpu.memory_space<vmem>>, vector<8x1xf32>
      tpu.vector_store %arg8[%c0_40, %c0_41], %56 {strides = array<i32>} : memref<8x1xf32, #tpu.memory_space<vmem>>, vector<8x1xf32>,
      %cst_42 = arith.constant 0.000000e+00 : f32
      %58 = vector.broadcast %cst_42 : f32 to vector<8x1xf32>
      %c0_43 = arith.constant 0 : index
      %c0_44 = arith.constant 0 : index
      %59 = vector.load %arg9[%c0_43, %c0_44] : memref<8x1xf32, #tpu.memory_space<vmem>>, vector<8x1xf32>
      tpu.vector_store %arg9[%c0_43, %c0_44], %58 {strides = array<i32>} : memref<8x1xf32, #tpu.memory_space<vmem>>, vector<8x1xf32>,
    } else {
    }
    %c0 = arith.constant 0 : index
    %c0_1 = arith.constant 0 : index
    %3 = vector.load %arg2[%c0, %c0_1] : memref<8x128xf32, #tpu.memory_space<vmem>>, vector<8x128xf32>
    %c0_2 = arith.constant 0 : index
    %c0_3 = arith.constant 0 : index
    %4 = vector.load %arg3[%c0_2, %c0_3] : memref<8x128xf32, #tpu.memory_space<vmem>>, vector<8x128xf32>
    %c0_4 = arith.constant 0 : index
    %c0_5 = arith.constant 0 : index
    %5 = vector.load %arg5[%c0_4, %c0_5] : memref<8x1xf32, #tpu.memory_space<vmem>>, vector<8x1xf32>
    %c0_6 = arith.constant 0 : index
    %c0_7 = arith.constant 0 : index
    %6 = vector.load %arg6[%c0_6, %c0_7] : memref<8x1xf32, #tpu.memory_space<vmem>>, vector<8x1xf32>
    %cst = arith.constant dense<0xFF800000> : vector<8xf32>
    %7 = vector.multi_reduction <maximumf>, %4, %cst [1] : vector<8x128xf32> to vector<8xf32>
    %8 = vector.shape_cast %7 : vector<8xf32> to vector<8x1xf32>
    %9 = arith.maximumf %5, %8 : vector<8x1xf32>
    %cst_8 = arith.constant dense<0xFF800000> : vector<8xf32>
    %10 = vector.multi_reduction <maximumf>, %3, %cst_8 [1] : vector<8x128xf32> to vector<8xf32>
    %11 = vector.shape_cast %10 : vector<8xf32> to vector<8x1xf32>
    %12 = arith.maximumf %6, %11 : vector<8x1xf32>
    %13 = arith.subf %5, %9 : vector<8x1xf32>
    %14 = math.exp %13 : vector<8x1xf32>
    %15 = arith.subf %6, %12 : vector<8x1xf32>
    %16 = math.exp %15 : vector<8x1xf32>
    %17 = vector.broadcast %9 : vector<8x1xf32> to vector<8x128xf32>
    %18 = arith.subf %4, %17 : vector<8x128xf32>
    %19 = math.exp %18 : vector<8x128xf32>
    %20 = vector.broadcast %12 : vector<8x1xf32> to vector<8x128xf32>
    %21 = arith.subf %3, %20 : vector<8x128xf32>
    %c0_9 = arith.constant 0 : index
    %c0_10 = arith.constant 0 : index
    %22 = vector.load %arg7[%c0_9, %c0_10] : memref<8x1xf32, #tpu.memory_space<vmem>>, vector<8x1xf32>
    %23 = arith.mulf %14, %22 : vector<8x1xf32>
    %cst_11 = arith.constant dense<0.000000e+00> : vector<8xf32>
    %24 = vector.multi_reduction <add>, %19, %cst_11 [1] : vector<8x128xf32> to vector<8xf32>
    %25 = vector.shape_cast %24 : vector<8xf32> to vector<8x1xf32>
    %26 = arith.addf %23, %25 : vector<8x1xf32>
    %c0_12 = arith.constant 0 : index
    %c0_13 = arith.constant 0 : index
    %27 = vector.load %arg7[%c0_12, %c0_13] : memref<8x1xf32, #tpu.memory_space<vmem>>, vector<8x1xf32>
    tpu.vector_store %arg7[%c0_12, %c0_13], %26 {strides = array<i32>} : memref<8x1xf32, #tpu.memory_space<vmem>>, vector<8x1xf32>,
    %c0_14 = arith.constant 0 : index
    %c0_15 = arith.constant 0 : index
    %28 = vector.load %arg8[%c0_14, %c0_15] : memref<8x1xf32, #tpu.memory_space<vmem>>, vector<8x1xf32>
    %29 = arith.mulf %16, %28 : vector<8x1xf32>
    %30 = math.exp %21 : vector<8x128xf32>
    %cst_16 = arith.constant dense<0.000000e+00> : vector<8xf32>
    %31 = vector.multi_reduction <add>, %30, %cst_16 [1] : vector<8x128xf32> to vector<8xf32>
    %32 = vector.shape_cast %31 : vector<8xf32> to vector<8x1xf32>
    %33 = arith.addf %29, %32 : vector<8x1xf32>
    %c0_17 = arith.constant 0 : index
    %c0_18 = arith.constant 0 : index
    %34 = vector.load %arg8[%c0_17, %c0_18] : memref<8x1xf32, #tpu.memory_space<vmem>>, vector<8x1xf32>
    tpu.vector_store %arg8[%c0_17, %c0_18], %33 {strides = array<i32>} : memref<8x1xf32, #tpu.memory_space<vmem>>, vector<8x1xf32>,
    %c0_19 = arith.constant 0 : index
    %c0_20 = arith.constant 0 : index
    %35 = vector.load %arg9[%c0_19, %c0_20] : memref<8x1xf32, #tpu.memory_space<vmem>>, vector<8x1xf32>
    %36 = arith.mulf %14, %35 : vector<8x1xf32>
    %37 = arith.subf %12, %6 : vector<8x1xf32>
    %38 = arith.mulf %37, %23 : vector<8x1xf32>
    %39 = arith.subf %36, %38 : vector<8x1xf32>
    %40 = arith.mulf %19, %21 : vector<8x128xf32>
    %cst_21 = arith.constant dense<0.000000e+00> : vector<8xf32>
    %41 = vector.multi_reduction <add>, %40, %cst_21 [1] : vector<8x128xf32> to vector<8xf32>
    %42 = vector.shape_cast %41 : vector<8xf32> to vector<8x1xf32>
    %43 = arith.addf %39, %42 : vector<8x1xf32>
    %c0_22 = arith.constant 0 : index
    %c0_23 = arith.constant 0 : index
    %44 = vector.load %arg9[%c0_22, %c0_23] : memref<8x1xf32, #tpu.memory_space<vmem>>, vector<8x1xf32>
    tpu.vector_store %arg9[%c0_22, %c0_23], %43 {strides = array<i32>} : memref<8x1xf32, #tpu.memory_space<vmem>>, vector<8x1xf32>,
    %c0_24 = arith.constant 0 : index
    %c0_25 = arith.constant 0 : index
    %45 = vector.load %arg5[%c0_24, %c0_25] : memref<8x1xf32, #tpu.memory_space<vmem>>, vector<8x1xf32>
    tpu.vector_store %arg5[%c0_24, %c0_25], %9 {strides = array<i32>} : memref<8x1xf32, #tpu.memory_space<vmem>>, vector<8x1xf32>,
    %c0_26 = arith.constant 0 : index
    %c0_27 = arith.constant 0 : index
    %46 = vector.load %arg6[%c0_26, %c0_27] : memref<8x1xf32, #tpu.memory_space<vmem>>, vector<8x1xf32>
    tpu.vector_store %arg6[%c0_26, %c0_27], %12 {strides = array<i32>} : memref<8x1xf32, #tpu.memory_space<vmem>>, vector<8x1xf32>,
    %c0_i32_28 = arith.constant 0 : i32
    %47 = arith.cmpi eq, %arg1, %c0_i32_28 : i32
    %48 = arith.extui %47 : i1 to i32
    %c0_i32_29 = arith.constant 0 : i32
    %49 = arith.cmpi ne, %48, %c0_i32_29 : i32
    scf.if %49 {
      %c0_30 = arith.constant 0 : index
      %c0_31 = arith.constant 0 : index
      %50 = vector.load %arg9[%c0_30, %c0_31] : memref<8x1xf32, #tpu.memory_space<vmem>>, vector<8x1xf32>
      %c0_32 = arith.constant 0 : index
      %c0_33 = arith.constant 0 : index
      %51 = vector.load %arg7[%c0_32, %c0_33] : memref<8x1xf32, #tpu.memory_space<vmem>>, vector<8x1xf32>
      %52 = tpu.reciprocal %51 : vector<8x1xf32> -> vector<8x1xf32>
      %53 = arith.mulf %50, %52 : vector<8x1xf32>
      %c0_34 = arith.constant 0 : index
      %c0_35 = arith.constant 0 : index
      %54 = vector.load %arg8[%c0_34, %c0_35] : memref<8x1xf32, #tpu.memory_space<vmem>>, vector<8x1xf32>
      %55 = math.log %54 : vector<8x1xf32>
      %56 = arith.subf %53, %55 : vector<8x1xf32>
      %c0_36 = arith.constant 0 : index
      %c0_37 = arith.constant 0 : index
      %57 = vector.load %arg4[%c0_36, %c0_37] : memref<8x1xf32, #tpu.memory_space<vmem>>, vector<8x1xf32>
      tpu.vector_store %arg4[%c0_36, %c0_37], %56 {strides = array<i32>} : memref<8x1xf32, #tpu.memory_space<vmem>>, vector<8x1xf32>,
    } else {
    }
    return
  }
  func.func @transform_0(%arg0: i32, %arg1: i32) -> (i32, i32) {
    %c0_i32 = arith.constant 0 : i32
    return %arg0, %arg1 : i32, i32
  }
  func.func @transform_1(%arg0: i32, %arg1: i32) -> (i32, i32) {
    %c0_i32 = arith.constant 0 : i32
    return %arg0, %arg1 : i32, i32
  }
  func.func @transform_2(%arg0: i32, %arg1: i32) -> (i32, i32) {
    %c0_i32 = arith.constant 0 : i32
    %c0_i32_0 = arith.constant 0 : i32
    return %arg0, %c0_i32 : i32, i32
  }
}

</mosaic_0001>

<bundles_post_ra>
// kernel: tpu_custom_call.1
= control target key start
LH: loop header
LB: loop body
LE: loop exit
PB: predicated region body
PF: predicated region fallthrough
CT: control target
= control target key end

     0   :  { %7 = vsyncpa [#allocation8], 0  ;;  %s801_s0 = inlined_call_operand.hbm [shape: f32[16,128], index: 0, kind: input, shape index: {}]   ;;  %s802_s1 = inlined_call_operand.hbm [shape: f32[16,128], index: 1, kind: input, shape index: {}]   ;;  %s803_s2 = inlined_call_operand.vmem [shape: f32[16,1], index: 2, kind: output, shape index: {}]  }
   0x1   :  { %9 = vsyncpa [#allocation8 + $0x1], 0 }
   0x2   :  { %10 = vsyncpa [#allocation10], 0 }
   0x3   :  { %12 = vsyncpa [#allocation10 + $0x1], 0  ;;  %s618_s9 = smov 0   ;;  %s620_s10 = smov 0  }
   0x4   :  { %s622_s11 = smov 0   ;;  %s624_s12 = smov 0  }
   0x5   :  { %s626_s13 = smov 0   ;;  %s628_s14 = smov 0  }
   0x6 LB: > { %s391_s15 = sadd.s32 4294967295, %s596_s14   ;;  %s30_s16 = sadd.s32 1, %s592_s13  ;;  %s596_s14 = sphi %s628_s14, %s18_s14   ;;  %s592_s13 = sphi %s626_s13, %s817_s13   ;;  %s588_s12 = sphi %s624_s12, %s816_s12   ;;  %s584_s11 = sphi %s622_s11, %s815_s11   ;;  %s580_s10 = sphi %s620_s10, %s814_s10   ;;  %s576_s9 = sphi %s618_s9, %s813_s9  }
   0x7   : > { %p32_p0 = scmp.ge.s32.totalorder %s30_s16, 2  ;;  %s39_s17 = sadd.s32 1, %s584_s11 }
   0x8   : > { %p46_p1 = scmp.ne.s32.totalorder %s584_s11, %s580_s10  ;;  %p47_p2 = scmp.eq.s32.totalorder %s596_s14, 0 }
   0x9   : > { %s819_s16 = smov (%p32_p0, %s30_s16), 0  ;;  %p52_p4 = scmp.ne.s32.totalorder %s580_s10, %s576_s9 }
   0xa   : > { %p654_p3 = por %p47_p2, %p46_p1  ;;  %s34_s19 = ssub.s32 %s592_s13, %s819_s16 }
   0xb   : > { %p53_p5 = scmp.eq.s32.totalorder %s391_s15, 0  ;;  %p37_p6 = scmp.eq.s32.totalorder %s34_s19, 0 }
   0xc   : > { %p416_p8 = scmp.lt.s32.totalorder %s596_s14, 2  ;;  %s670_s22 = sand.u32 1, %s584_s11  }
   0xd   : > { %p661_p7 = por %p53_p5, %p52_p4  ;;  %s396_s23 = sshll.u32 %s592_s13, 7 }
   0xe   : > { %s667_s21 = scalar_select %p37_p6, %s584_s11, %s39_s17  }
   0xf   : > { %s806_s20 = scalar_select %p661_p7, 1, 0 }
  0x10   : > { %s395_s24 = sshll.u32 %s670_s22, 3  ;;  %s679_s27 = scalar_lea.hbm %s801_s0, %s396_s23 }
  0x11   : > { %s134_s28 = scalar_lea.vmem [#allocation7], %s395_s24  ;;  %p685_p9 = pnand %p416_p8, %p654_p3 }
  0x12   : > { %s142_s29 = sshll.u32 %s134_s28, 4  ;;  %s131_s3 = scalar_lea.sflag [#allocation8], %s670_s22  ;;  %s689_s29 = int_to_ptr.vmem [resolvable:$true] %s142_s29 }
  0x13   : > { %s482_s4 = scalar_lea.hbm %s679_s27, 128  ;;  %p484_p13 = pneg %p685_p9 }
  0x14   : > { %p483_p12 = scmp.ne.s32.totalorder %s679_s27, %s482_s4  ;;  %s487_s7 = scalar_lea.hbm %s801_s0, 256 }
  0x15   : > { %p488_p2 = scmp.lt.u32.totalorder %s679_s27, %s801_s0  ;;  %p489_p3 = scmp.lt.u32.totalorder %s487_s7, %s482_s4 }
  0x16   : > { %p485_p0 = pnand %p484_p13, %p483_p12  ;;  %p491_p5 = scmp.lt.u32.totalorder %s482_s4, %s679_s27 }
  0x17   : > { %p490_p4 = por %p489_p3, %p488_p2 }
  0x18   : > { %p486_p1 = pneg %p485_p0 }
  0x19   : > { %p492_p6 = por %p491_p5, %p490_p4 }
  0x1b   : > { %p493_p8 = pnand %p492_p6, %p486_p1 }
  0x1d   : > { %496 = shalt.err (!%p493_p8)
}
  0x1e   : > { %s497_s15 = scalar_lea.vmem %s689_s29, 128  ;;  %s598_s17 = smov [#allocation7]  }
  0x1f   : > { %p498_p12 = scmp.ne.s32.totalorder %s689_s29, %s497_s15  ;;  %s502_s18 = sshll.u32 %s598_s17, 4  ;;  %s503_s18 = int_to_ptr.vmem [resolvable:$false] %s502_s18 }
  0x20   : > { %s504_s19 = scalar_lea.vmem %s503_s18, 256  ;;  %p505_p11 = scmp.lt.s32.totalorder %s689_s29, %s503_s18 }
  0x21   : > { %p500_p0 = pnand %p498_p12, %p484_p13  ;;  %p506_p2 = scmp.lt.s32.totalorder %s504_s19, %s497_s15 }
  0x23   : > { %p501_p10 = pneg %p500_p0  ;;  %p507_p3 = por %p506_p2, %p505_p11 }
  0x25   : > { %p508_p4 = pnand %p507_p3, %p501_p10 }
  0x27   : > { %511 = shalt.err (!%p508_p4)
}
  0x28   : > { %412 = dma.hbm_to_vmem [thread:$0]  (!%p685_p9), %s679_s27, 128, %s689_s29, %s131_s3  }
  0x29   : > { %p808_p1 = scmp.lt.s32.totalorder %s596_s14, 3  ;;  %p809_p5 = scmp.ge.s32.totalorder %s596_s14, 1 }
  0x2a   : > { %s732_s4 = scalar_lea.hbm %s802_s1, %s396_s23  ;;  %s153_s5 = scalar_lea.vmem [#allocation9], %s395_s24 }
  0x2b   : > { %p723_p6 = pnand %p809_p5, %p808_p1  ;;  %s161_s6 = sshll.u32 %s153_s5, 4  ;;  %s162_s6 = int_to_ptr.vmem [resolvable:$true] %s161_s6 }
  0x2c   : > { %s150_s27 = scalar_lea.sflag [#allocation10], %s670_s22  ;;  %s512_s29 = scalar_lea.hbm %s732_s4, 128 }
  0x2d   : > { %s810_s25 = scalar_select %p723_p6, 1, 0 }
  0x2e   : > { %p513_p10 = scmp.ne.s32.totalorder %s732_s4, %s512_s29  ;;  %s517_s23 = scalar_lea.hbm %s802_s1, 256 }
  0x2f   : > { %p518_p12 = scmp.lt.u32.totalorder %s732_s4, %s802_s1  ;;  %p519_p0 = scmp.lt.u32.totalorder %s517_s23, %s512_s29 }
  0x30   : > { %p515_p11 = pnand %p513_p10, %p484_p13  ;;  %p521_p3 = scmp.lt.u32.totalorder %s512_s29, %s732_s4 }
  0x31   : > { %p520_p2 = por %p519_p0, %p518_p12 }
  0x32   : > { %p516_p8 = pneg %p515_p11 }
  0x33   : > { %p522_p4 = por %p521_p3, %p520_p2 }
  0x35   : > { %p523_p1 = pnand %p522_p4, %p516_p8 }
  0x37   : > { %526 = shalt.err (!%p523_p1)
}
  0x38   : > { %s527_s22 = scalar_lea.vmem %s162_s6, 128  ;;  %s599_s24 = smov [#allocation9]  }
  0x39   : > { %p528_p5 = scmp.ne.s32.totalorder %s162_s6, %s527_s22  ;;  %s532_s15 = sshll.u32 %s599_s24, 4  ;;  %s533_s15 = int_to_ptr.vmem [resolvable:$false] %s532_s15 }
  0x3a   : > { %s534_s17 = scalar_lea.vmem %s533_s15, 256  ;;  %p535_p7 = scmp.lt.s32.totalorder %s162_s6, %s533_s15 }
  0x3b   : > { %p530_p10 = pnand %p528_p5, %p484_p13  ;;  %p536_p6 = scmp.lt.s32.totalorder %s534_s17, %s527_s22 }
  0x3d   : > { %p531_p11 = pneg %p530_p10  ;;  %p537_p0 = por %p536_p6, %p535_p7 }
  0x3f   : > { %p538_p12 = pnand %p537_p0, %p531_p11 }
  0x41   : > { %541 = shalt.err (!%p538_p12)
}
  0x42   : > { %415 = dma.hbm_to_vmem [thread:$0]  (!%p685_p9), %s732_s4, 128, %s162_s6, %s150_s27  }
  0x43   : > { %p811_p8 = scmp.ne.s32.totalorder %s810_s25, 0 }
  0x44   : > { %s172_s18 = sand.u32 (!%p811_p8), 1, %s580_s10   ;;  %p812_p13 = scmp.ne.s32.totalorder (!%p811_p8), %s806_s20, 0 }
  0x45   : > { %170 = sbr.rel (%p811_p8) target bundleno = 539 (0x21b), region = 28  ;;  %s400_s19 = sshll.u32 (!%p811_p8), %s172_s18, 3 }
  0x46   : > { %s173_s26 = scalar_lea.sflag (!%p811_p8), [#allocation8], %s172_s18  ;;  %s176_s28 = scalar_lea.vmem (!%p811_p8), [#allocation7], %s400_s19 }
  0x4c   : > { %567 = dma.done.wait (%p812_p13), %s173_s26, 128  }
  0x4d   : > { %569 = vsyncadd (%p812_p13), %s173_s26, 4294967168  ;;  %s182_s5 = scalar_lea.sflag [#allocation10], %s172_s18  ;;  %s185_s29 = scalar_lea.vmem [#allocation9], %s400_s19 }
  0x4e   : > { %571 = dma.done.wait (%p812_p13), %s182_s5, 128  }
  0x4f   : > { %573 = vsyncadd (%p812_p13), %s182_s5, 4294967168  ;;  %vm218_vm0 = vcmask 7168   ;;  %v600_v0 = vmov -1e+30   ;;  %v225_v1 = vld [vmem:[%s185_s29] sm:$0xff]  ;;  %v224_v2 = vld [vmem:[%s176_s28] sm:$0xff] }
  0x50   : > { %219 = vst.msk [vmem:[#allocation2] sm:$0xff] %vm218_vm0, %v600_v0  ;;  %220 = vst.msk [vmem:[#allocation3] sm:$0xff] %vm218_vm0, %v600_v0  ;;  %228 = vmax.xlane.f32.xlu0 %v225_v1  ;;  %v601_v3 = vmov 0   ;;  %v602_v4 = vmov 0.0   ;;  %p210_p7 = scmp.lt.s32.totalorder %s588_s12, 1 }
  0x51   : > { %468 = vset.pattern.permute.xlu1 %v601_v3  ;;  %469 = vset.pattern.permute.xlu0 %v601_v3  ;;  %221 = vst.msk [vmem:[#allocation4] sm:$0xff] %vm218_vm0, %v602_v4  ;;  %222 = vst.msk [vmem:[#allocation5] sm:$0xff] %vm218_vm0, %v602_v4 }
  0x52   : > { %223 = vst.msk [vmem:[#allocation6] sm:$0xff] %vm218_vm0, %v602_v4  ;;  %s821_s12 = smov (!%p210_p7, %s588_s12), 1 }
  0x53   : > { %s402_s20 = sshll.u32 %s821_s12, 3 }
  0x54   : > { %231 = vmax.xlane.f32.xlu0 %v224_v2  ;;  %s213_s4 = scalar_lea.vmem %s803_s2, %s402_s20 }
  0x57   : > { %v226_v5 = vld [vmem:[#allocation2] sm:$0xff]  ;;  %v227_v8 = vld [vmem:[#allocation3] sm:$0xff] }
  0x58   : > { %v254_v15 = vld [vmem:[#allocation4] sm:$0xff]  ;;  %v261_v34 = vld [vmem:[#allocation5] sm:$0xff] }
  0x59   : > { %v269_v17 = vld [vmem:[#allocation6] sm:$0xff] }
  0xdd   : > { %v229_v6 = vpop.xlane.xlu0 %228 }
  0xde   : > { %v230_v7 = vmax.f32 %v226_v5, %v229_v6 }
  0xe0   : > { %v234_v9 = vsub.f32 %v226_v5, %v230_v7  ;;  %279 = vst.msk [vmem:[#allocation2] sm:$0xff] %vm218_vm0, %v230_v7  ;;  %242 = vperm.xlu1 %468, %v230_v7  }
  0xe1   : > { %v232_v10 = vpop.xlane.xlu0 %231 }
  0xe2   : > { %v235_v11 = vmul.f32 1.442695, %v234_v9  ;;  %v233_v12 = vmax.f32 %v227_v8, %v232_v10 }
  0xe4   : > { %470 = vpow2.f32 %v235_v11  ;;  %v237_v13 = vsub.f32 %v227_v8, %v233_v12  ;;  %280 = vst.msk [vmem:[#allocation3] sm:$0xff] %vm218_vm0, %v233_v12  ;;  %250 = vperm.xlu1 %468, %v233_v12   ;;  %v271_v14 = vsub.f32 %v233_v12, %v227_v8 }
  0xe6   : > { %v238_v31 = vmul.f32 1.442695, %v237_v13 }
  0xee   : > { %v471_v16 = vpop.eup %470 }
  0xef   : > { %v255_v18 = vmul.f32 %v471_v16, %v254_v15  ;;  %v270_v19 = vmul.f32 %v471_v16, %v269_v17 }
  0xf1   : > { %v272_v20 = vmul.f32 %v271_v14, %v255_v18 }
  0xf3   : > { %v273_v21 = vsub.f32 %v270_v19, %v272_v20 }
 0x15f   : > { %v243_v22 = vpop.permute.xlu1 %242 }
 0x160   : > { %v245_v23 = vsub.f32 %v225_v1, %v243_v22 }
 0x162   : > { %v246_v24 = vmul.f32 1.442695, %v245_v23 }
 0x163   : > { %v251_v25 = vpop.permute.xlu1 %250 }
 0x164   : > { %472 = vpow2.f32 %v246_v24  ;;  %v253_v26 = vsub.f32 %v224_v2, %v251_v25 }
 0x166   : > { %v263_v27 = vmul.f32 1.442695, %v253_v26 }
 0x168   : > { %474 = vpow2.f32 %v263_v27 }
 0x169   : > { %476 = vpow2.f32 %v238_v31 }
 0x16e   : > { %v473_v28 = vpop.eup %472 }
 0x16f   : > { %256 = vadd.xlane.f32.xlu0 %v473_v28  ;;  %v274_v29 = vmul.f32 %v473_v28, %v253_v26 }
 0x172   : > { %v475_v30 = vpop.eup %474 }
 0x173   : > { %275 = vadd.xlane.f32.xlu0 %v274_v29  ;;  %265 = vadd.xlane.f32.xlu1 %v475_v30  ;;  %v477_v32 = vpop.eup %476 }
 0x174   : > { %v262_v36 = vmul.f32 %v477_v32, %v261_v34 }
 0x1fc   : > { %v257_v33 = vpop.xlane.xlu0 %256 }
 0x1fd   : > { %v258_v35 = vadd.f32 %v257_v33, %v255_v18 }
 0x1ff   : > { %260 = vst.msk [vmem:[#allocation4] sm:$0xff] %vm218_vm0, %v258_v35 }
 0x200   : > { %v276_v37 = vpop.xlane.xlu0 %275  ;;  %v266_v38 = vpop.xlane.xlu1 %265 }
 0x201   : > { %v277_v39 = vadd.f32 %v276_v37, %v273_v21  ;;  %v267_v40 = vadd.f32 %v266_v38, %v262_v36 }
 0x203   : > { %278 = vst.msk [vmem:[#allocation6] sm:$0xff] %vm218_vm0, %v277_v39  ;;  %268 = vst.msk [vmem:[#allocation5] sm:$0xff] %vm218_vm0, %v267_v40 }
 0x206   : > { %v285_v41 = vld [vmem:[#allocation4] sm:$0xff] }
 0x207   : > { %478 = vrcp.f32 %v285_v41 }
 0x20a   : > { %v288_v42 = vld [vmem:[#allocation5] sm:$0xff]  ;;  %v284_v45 = vld [vmem:[#allocation6] sm:$0xff] }
 0x20b   : > { %480 = vlog2.f32 %v288_v42 }
 0x211   : > { %v479_v43 = vpop.eup %478 }
 0x212   : > { %v287_v46 = vmul.f32 %v479_v43, %v284_v45 }
 0x215   : > { %v481_v44 = vpop.eup %480 }
 0x216   : > { %v290_v47 = vmul.f32 0.6931472, %v481_v44 }
 0x218   : > { %v291_v48 = vsub.f32 %v287_v46, %v290_v47 }
 0x21a   : > { %292 = vst.msk [vmem:[%s213_s4] sm:$0xff] %vm218_vm0, %v291_v48 }
 0x21b PF: > { %s18_s14 = sadd.s32 1, %s596_s14   ;;  %s813_s9 = smov %s580_s10 }
 0x21c   : > { %p15_p9 = scmp.ge.s32.totalorder %s18_s14, 4   ;;  %s814_s10 = smov %s584_s11 }
 0x21d   : > { %s815_s11 = smov %s667_s21  ;;  %s816_s12 = smov %s592_s13 }
 0x21e   : > { %s817_s13 = smov %s819_s16  ;;  %17 = sbr.rel (!%p15_p9) target bundleno = 6 (0x6), region = 89 }
 0x225   :  { %312 = vsyncpa [#allocation8], 1 }
 0x226   :  { %314 = vsyncpa [#allocation8 + $0x1], 1 }
 0x227   :  { %315 = vsyncpa [#allocation10], 1 }
 0x228   :  { %317 = vsyncpa [#allocation10 + $0x1], 1 }

</bundles_post_ra>
